<compile_context>
chip_gen: v7x
topology: tpu7x:2x2x1
jax: 0.10.0
libtpu: 0.0.40
codegen_flags: <defaults>
</compile_context>

<pallas_src>
import functools

import jax
import jax.numpy as jnp
from jax import lax
from jax.experimental import pallas as pl
from jax.experimental.pallas import tpu as pltpu

EPS = 1e-5
_MIB = 1024 * 1024


# ----------------------------- Pallas kernels ------------------------------ #

def _gemm_bn_act_kernel(p_ref, w_ref, b_ref, o_ref, acc_ref, *, relu):
    """o = act(p @ w + b).  bf16 MXU operands, f32 VMEM accumulation."""
    k = pl.program_id(2)
    prod = jnp.dot(p_ref[...], w_ref[...], preferred_element_type=jnp.float32)

    @pl.when(k == 0)
    def _init():                      # direct write: no zero-fill + reload pass
        acc_ref[...] = prod

    @pl.when(k > 0)
    def _accum():
        acc_ref[...] += prod

    @pl.when(k == pl.num_programs(2) - 1)
    def _epilogue():
        y = acc_ref[...] + b_ref[...]
        if relu:
            y = jnp.maximum(y, 0.0)
        o_ref[...] = y.astype(o_ref.dtype)


def _gemm_bn_res_relu_kernel(p_ref, w_ref, b_ref, r_ref, o_ref, acc_ref):
    """o = relu(p @ w + b + r)  (identity shortcut; residual kept in f32)."""
    k = pl.program_id(2)
    prod = jnp.dot(p_ref[...], w_ref[...], preferred_element_type=jnp.float32)

    @pl.when(k == 0)
    def _init():
        acc_ref[...] = prod

    @pl.when(k > 0)
    def _accum():
        acc_ref[...] += prod

    @pl.when(k == pl.num_programs(2) - 1)
    def _epilogue():
        y = acc_ref[...] + b_ref[...] + r_ref[...].astype(jnp.float32)
        o_ref[...] = jnp.maximum(y, 0.0).astype(o_ref.dtype)


def _gemm_bn_proj_relu_kernel(p_ref, w_ref, b_ref, xs_ref, wsc_ref, o_ref,
                              acc_ref):
    """o = relu(p @ w + xs @ wsc + b).

    The 1x1 projection shortcut is accumulated into the same f32 accumulator
    (fused; no separate pallas_call, no bf16 residual HBM round trip)."""
    k = pl.program_id(2)
    prod = jnp.dot(p_ref[...], w_ref[...], preferred_element_type=jnp.float32)

    @pl.when(k == 0)
    def _init():
        acc_ref[...] = prod + jnp.dot(xs_ref[...], wsc_ref[...],
                                      preferred_element_type=jnp.float32)

    @pl.when(k > 0)
    def _accum():
        acc_ref[...] += prod

    @pl.when(k == pl.num_programs(2) - 1)
    def _epilogue():
        y = acc_ref[...] + b_ref[...]
        o_ref[...] = jnp.maximum(y, 0.0).astype(o_ref.dtype)


# ------------------------------ GEMM wrapper -------------------------------- #

def _round_up(x, m):
    return (x + m - 1) // m * m


def _largest_divisor(n, candidates):
    for c in candidates:
        if n % c == 0:
            return c
    return candidates[-1]


def _pad2(a, rows, cols):
    r, c = a.shape
    if (r, c) == (rows, cols):
        return a
    return jnp.pad(a, ((0, rows - r), (0, cols - c)))


def _vmem_limit_bytes():
    """Generation-aware scoped-VMEM budget (raised on 128-MiB parts, kept at
    the default on v7x's 64-MiB-per-TC parts)."""
    cap = 128 * _MIB
    try:
        cap = int(pltpu.get_tpu_info().vmem_capacity_bytes)
    except Exception:
        pass
    return max(32 * _MIB, min(int(cap * 0.45), 80 * _MIB))


def fused_gemm_bn(patches, w, bias, *, residual=None, proj=None, relu=True,
                  out_dtype=jnp.float32):
    """act(patches @ w + bias [+ residual | + xs @ wsc]) with BN folded into w.

    patches: (M, K)   w: (K, Cout)   bias: (Cout,)
    residual: (M, Cout) f32, added in the epilogue (identity shortcut)
    proj: (xs (M, Cin), wsc (Cin, Cout)) — fused 1x1 projection shortcut
    Returns (M, Cout) in out_dtype.
    """
    M, K = patches.shape
    Cout = w.shape[1]

    Kp = _round_up(K, 128)
    Np = _round_up(Cout, 128)
    Mp = _round_up(M, 128)

    # Tile selection: lane-dense (multiples of 128 on the last dim), weight
    # dim resident when moderate, M tile = largest divisor of Mp (no extra
    # padding), and >= 2 blocks on the parallel axes when possible (v7x TCs).
    tn = Np if Np <= 512 else _largest_divisor(Np, (512, 256, 128))
    tk = _largest_divisor(Kp, (512, 384, 256, 128))
    tm = _largest_divisor(Mp, (1024, 512, 384, 256, 128))
    if (Mp // tm) * (Np // tn) < 2:
        if tm >= 256:
            tm //= 2
        elif tn >= 256:
            tn //= 2

    p_pad = _pad2(patches.astype(jnp.bfloat16), Mp, Kp)
    w_pad = _pad2(w.astype(jnp.bfloat16), Kp, Np)
    b_pad = _pad2(bias.reshape(1, Cout).astype(jnp.float32), 1, Np)

    in_specs = [
        pl.BlockSpec((tm, tk), lambda i, j, k: (i, k)),   # activations (im2col)
        pl.BlockSpec((tk, tn), lambda i, j, k: (k, j)),   # weights (BN folded)
        pl.BlockSpec((1, tn), lambda i, j, k: (0, j)),    # folded BN bias
    ]
    args = [p_pad, w_pad, b_pad]
    extra_bytes = 0
    extra_flops = 0

    if proj is not None:
        xs, wsc = proj
        cin_p = _round_up(xs.shape[1], 8)
        kernel = _gemm_bn_proj_relu_kernel
        in_specs += [
            pl.BlockSpec((tm, cin_p), lambda i, j, k: (i, 0)),   # shortcut in
            pl.BlockSpec((cin_p, tn), lambda i, j, k: (0, j)),   # 1x1 weight
        ]
        args += [_pad2(xs.astype(jnp.bfloat16), Mp, cin_p),
                 _pad2(wsc.astype(jnp.bfloat16), cin_p, Np)]
        extra_bytes = Mp * cin_p * 2 + cin_p * Np * 2
        extra_flops = 2 * Mp * cin_p * Np
    elif residual is not None:
        kernel = _gemm_bn_res_relu_kernel
        in_specs.append(pl.BlockSpec((tm, tn), lambda i, j, k: (i, j)))
        args.append(_pad2(residual.astype(jnp.float32), Mp, Np))
        extra_bytes = Mp * Np * 4
    else:
        kernel = functools.partial(_gemm_bn_act_kernel, relu=relu)

    grid = (Mp // tm, Np // tn, Kp // tk)
    out_itemsize = jnp.dtype(out_dtype).itemsize
    cost = pl.CostEstimate(
        flops=2 * Mp * Kp * Np + extra_flops,
        transcendentals=0,
        # Includes grid re-streaming: activations re-read once per j block,
        # weights once per i block.
        bytes_accessed=(Mp * Kp * 2) * (Np // tn) + (Kp * Np * 2) * (Mp // tm)
        + Np * 4 + Mp * Np * out_itemsize + extra_bytes,
    )

    out = pl.pallas_call(
        kernel,
        out_shape=jax.ShapeDtypeStruct((Mp, Np), out_dtype),
        grid=grid,
        in_specs=in_specs,
        out_specs=pl.BlockSpec((tm, tn), lambda i, j, k: (i, j)),
        scratch_shapes=[pltpu.VMEM((tm, tn), jnp.float32)],
        compiler_params=pltpu.CompilerParams(
            dimension_semantics=("parallel", "parallel", "arbitrary"),
            vmem_limit_bytes=_vmem_limit_bytes(),
        ),
        cost_estimate=cost,
    )(*args)

    if Mp != M or Np != Cout:
        out = out[:M, :Cout]
    return out


# ------------------------------ JAX glue ----------------------------------- #

def _im2col_3x3_nhwc(x, stride):
    """3x3 / pad-1 patches of an NHWC tensor.

    Returns ((N*Ho*Wo, 9*C), Ho, Wo).  K ordering is tap-major:
    k = (kh*3 + kw)*C + c, which matches w_hwio.reshape(9*C, Cout).
    # TODO(synk): this still materializes the 9x patch matrix in HBM; an
    # in-kernel 3x3 tap loop over halo'd NHWC tiles would remove that traffic.
    """
    N, H, W, C = x.shape
    Ho = (H - 1) // stride + 1
    Wo = (W - 1) // stride + 1
    xp = jnp.pad(x, ((0, 0), (1, 1), (1, 1), (0, 0)))
    taps = []
    for kh in range(3):
        for kw in range(3):
            taps.append(xp[:, kh:kh + (Ho - 1) * stride + 1:stride,
                           kw:kw + (Wo - 1) * stride + 1:stride, :])
    p = jnp.concatenate(taps, axis=-1)          # (N, Ho, Wo, 9*C)
    return p.reshape(N * Ho * Wo, 9 * C), Ho, Wo


def _fold_bn(bn):
    gamma, beta, mean, var = bn
    scale = gamma * lax.rsqrt(var + EPS)
    return scale, beta - mean * scale


def init_basic_block_params(key, cin, cout, stride):
    ks = jax.random.split(key, 16)

    def conv_w(k, kh, kw, ci, co):
        fan_in = kh * kw * ci
        return jax.random.normal(k, (kh, kw, ci, co), jnp.float32) * (2.0 / fan_in) ** 0.5

    def bn(kg, kb, km, kv, c):
        gamma = 1.0 + 0.1 * jax.random.normal(kg, (c,), jnp.float32)
        beta = 0.1 * jax.random.normal(kb, (c,), jnp.float32)
        rmean = 0.1 * jax.random.normal(km, (c,), jnp.float32)
        rvar = jnp.abs(jax.random.normal(kv, (c,), jnp.float32)) + 0.5
        return gamma, beta, rmean, rvar

    params = {
        "w1": conv_w(ks[0], 3, 3, cin, cout),
        "bn1": bn(ks[1], ks[2], ks[3], ks[4], cout),
        "w2": conv_w(ks[5], 3, 3, cout, cout),
        "bn2": bn(ks[6], ks[7], ks[8], ks[9], cout),
    }
    if stride != 1 or cin != cout:
        params["w_sc"] = conv_w(ks[10], 1, 1, cin, cout)
        params["bn_sc"] = bn(ks[11], ks[12], ks[13], ks[14], cout)
    return params


def basic_block_forward(x_nchw, params, stride):
    # NHWC internally: one transpose in, one transpose out; no interior
    # layout round trips between the two convs.
    x = jnp.transpose(x_nchw.astype(jnp.float32), (0, 2, 3, 1))
    N, H, W, Cin = x.shape
    Cout = params["w1"].shape[-1]

    s1, b1 = _fold_bn(params["bn1"])
    s2, b2 = _fold_bn(params["bn2"])

    x_bf = x.astype(jnp.bfloat16)

    # conv1 (3x3, stride) + bn1 + relu  ->  bf16 NHWC intermediate.
    p1, Ho, Wo = _im2col_3x3_nhwc(x_bf, stride)
    w1 = params["w1"].reshape(9 * Cin, Cout) * s1[None, :]       # fold BN scale
    y1 = fused_gemm_bn(p1, w1, b1, relu=True, out_dtype=jnp.bfloat16)
    M = N * Ho * Wo

    # conv2 (3x3, stride 1) + bn2 + shortcut + relu  ->  f32 output.
    p2, _, _ = _im2col_3x3_nhwc(y1.reshape(N, Ho, Wo, Cout), 1)
    w2 = params["w2"].reshape(9 * Cout, Cout) * s2[None, :]

    if "w_sc" in params:
        # 1x1 projection shortcut fused into the conv2 kernel (f32 accum).
        ssc, bsc = _fold_bn(params["bn_sc"])
        xs = x_bf[:, ::stride, ::stride, :].reshape(M, Cin)
        wsc = params["w_sc"].reshape(Cin, Cout) * ssc[None, :]
        out = fused_gemm_bn(p2, w2, b2 + bsc, proj=(xs, wsc),
                            out_dtype=jnp.float32)
    else:
        # Identity shortcut, kept in f32 and added in the conv2 epilogue.
        res = x.reshape(M, Cout)
        out = fused_gemm_bn(p2, w2, b2, residual=res, out_dtype=jnp.float32)

    return jnp.transpose(out.reshape(N, Ho, Wo, Cout), (0, 3, 1, 2))


# --------------------------- pure-JAX reference ----------------------------- #

def ref_block(x_nchw, params, stride):
    def conv(x, w_hwio, s, pad):
        w_oihw = jnp.transpose(w_hwio, (3, 2, 0, 1))
        return lax.conv_general_dilated(
            x, w_oihw, (s, s), pad, dimension_numbers=("NCHW", "OIHW", "NCHW"))

    def bn(x, p):
        gamma, beta, mean, var = p
        sc = gamma * lax.rsqrt(var + EPS)
        bi = beta - mean * sc
        return x * sc[None, :, None, None] + bi[None, :, None, None]

    out = jax.nn.relu(bn(conv(x_nchw, params["w1"], stride, [(1, 1), (1, 1)]), params["bn1"]))
    out = bn(conv(out, params["w2"], 1, [(1, 1), (1, 1)]), params["bn2"])
    if "w_sc" in params:
        sc = bn(conv(x_nchw, params["w_sc"], stride, [(0, 0), (0, 0)]), params["bn_sc"])
    else:
        sc = x_nchw
    return jax.nn.relu(out + sc)


def _check(out, ref, name):
    diff = jnp.abs(out - ref)
    ref_max = float(jnp.max(jnp.abs(ref))) + 1e-6
    max_err = float(jnp.max(diff))
    rms_err = float(jnp.sqrt(jnp.mean(diff * diff)))
    # bf16 MXU operands with f32 accumulation -> relaxed (relative) tolerance.
    assert max_err < 5e-2 * ref_max + 2e-2, (name, max_err, ref_max)
    assert rms_err < 1e-2 * ref_max + 5e-3, (name, rms_err, ref_max)


if __name__ == "__main__":
    key = jax.random.PRNGKey(0)
    kx, kp1, kp2 = jax.random.split(key, 3)

    x = jax.random.normal(kx, (2, 4, 16, 16), jnp.float32)

    fwd = jax.jit(basic_block_forward, static_argnums=2)

    # Case 1: downsampling block (in=4, out=8, stride=2) -> fused projection.
    params = init_basic_block_params(kp1, 4, 8, stride=2)
    out = jax.block_until_ready(fwd(x, params, 2))
    ref = ref_block(x, params, 2)
    assert out.shape == (2, 8, 8, 8), out.shape
    _check(out, ref, "downsample")

    # Case 2: identity-shortcut block (in=out=4, stride=1).
    params_id = init_basic_block_params(kp2, 4, 4, stride=1)
    out_id = jax.block_until_ready(fwd(x, params_id, 1))
    ref_id = ref_block(x, params_id, 1)
    assert out_id.shape == (2, 4, 16, 16), out_id.shape
    _check(out_id, ref_id, "identity")

    print("KERNEL_OK")
</pallas_src>

<mosaic_0001>
module attributes {stable_mosaic.version = 11 : i64} {
  func.func @_gemm_bn_act_kernel(%arg0: i32, %arg1: i32, %arg2: i32, %arg3: memref<128x128xbf16, #tpu.memory_space<vmem>>, %arg4: memref<128x128xbf16, #tpu.memory_space<vmem>>, %arg5: memref<1x128xf32, #tpu.memory_space<vmem>>, %arg6: memref<128x128xbf16, #tpu.memory_space<vmem>>, %arg7: memref<128x128xf32, #tpu.memory_space<vmem>>) attributes {dimension_semantics = [#tpu.dimension_semantics<parallel>, #tpu.dimension_semantics<parallel>, #tpu.dimension_semantics<arbitrary>], iteration_bounds = array<i64: 1, 1, 1>, scalar_prefetch = 0 : i64, scratch_operands = 1 : i64, tpu.core_type = #tpu.core_type<tc>, window_params = [{transform_indices = @transform_0, window_bounds = array<i64: 128, 128>}, {transform_indices = @transform_1, window_bounds = array<i64: 128, 128>}, {transform_indices = @transform_2, window_bounds = array<i64: 1, 128>}, {transform_indices = @transform_3, window_bounds = array<i64: 128, 128>}]} {
    %c0 = arith.constant 0 : index
    %c0_0 = arith.constant 0 : index
    %0 = vector.load %arg3[%c0, %c0_0] : memref<128x128xbf16, #tpu.memory_space<vmem>>, vector<128x128xbf16>
    %c0_1 = arith.constant 0 : index
    %c0_2 = arith.constant 0 : index
    %1 = vector.load %arg4[%c0_1, %c0_2] : memref<128x128xbf16, #tpu.memory_space<vmem>>, vector<128x128xbf16>
    %cst = arith.constant dense<0.000000e+00> : vector<128x128xf32>
    %2 = tpu.matmul %0, %1, %cst {dimension_numbers = #tpu.dot_dimension_numbers<[1], [0], [0], [1], [0, 0, 1, 1], [], []>} : vector<128x128xbf16>, vector<128x128xbf16>, vector<128x128xf32> -> vector<128x128xf32>
    %c0_i32 = arith.constant 0 : i32
    %3 = arith.cmpi eq, %arg2, %c0_i32 : i32
    %4 = arith.extui %3 : i1 to i32
    %c0_i32_3 = arith.constant 0 : i32
    %5 = arith.cmpi ne, %4, %c0_i32_3 : i32
    scf.if %5 {
      %c0_8 = arith.constant 0 : index
      %c0_9 = arith.constant 0 : index
      %12 = vector.load %arg7[%c0_8, %c0_9] : memref<128x128xf32, #tpu.memory_space<vmem>>, vector<128x128xf32>
      tpu.vector_store %arg7[%c0_8, %c0_9], %2 {strides = array<i32>} : memref<128x128xf32, #tpu.memory_space<vmem>>, vector<128x128xf32>,
    } else {
    }
    %c0_i32_4 = arith.constant 0 : i32
    %6 = arith.cmpi sgt, %arg2, %c0_i32_4 : i32
    %7 = arith.extui %6 : i1 to i32
    %c0_i32_5 = arith.constant 0 : i32
    %8 = arith.cmpi ne, %7, %c0_i32_5 : i32
    scf.if %8 {
      %c0_8 = arith.constant 0 : index
      %c0_9 = arith.constant 0 : index
      %12 = vector.load %arg7[%c0_8, %c0_9] : memref<128x128xf32, #tpu.memory_space<vmem>>, vector<128x128xf32>
      %13 = arith.addf %12, %2 : vector<128x128xf32>
      %c0_10 = arith.constant 0 : index
      %c0_11 = arith.constant 0 : index
      %14 = vector.load %arg7[%c0_10, %c0_11] : memref<128x128xf32, #tpu.memory_space<vmem>>, vector<128x128xf32>
      tpu.vector_store %arg7[%c0_10, %c0_11], %13 {strides = array<i32>} : memref<128x128xf32, #tpu.memory_space<vmem>>, vector<128x128xf32>,
    } else {
    }
    %c0_i32_6 = arith.constant 0 : i32
    %9 = arith.cmpi eq, %arg2, %c0_i32_6 : i32
    %10 = arith.extui %9 : i1 to i32
    %c0_i32_7 = arith.constant 0 : i32
    %11 = arith.cmpi ne, %10, %c0_i32_7 : i32
    scf.if %11 {
      %c0_8 = arith.constant 0 : index
      %c0_9 = arith.constant 0 : index
      %12 = vector.load %arg7[%c0_8, %c0_9] : memref<128x128xf32, #tpu.memory_space<vmem>>, vector<128x128xf32>
      %c0_10 = arith.constant 0 : index
      %c0_11 = arith.constant 0 : index
      %13 = vector.load %arg5[%c0_10, %c0_11] : memref<1x128xf32, #tpu.memory_space<vmem>>, vector<1x128xf32>
      %14 = vector.broadcast %13 : vector<1x128xf32> to vector<128x128xf32>
      %15 = arith.addf %12, %14 : vector<128x128xf32>
      %cst_12 = arith.constant 0.000000e+00 : f32
      %16 = vector.broadcast %cst_12 : f32 to vector<128x128xf32>
      %17 = arith.maximumf %15, %16 : vector<128x128xf32>
      %18 = arith.truncf %17 : vector<128x128xf32> to vector<128x128xbf16>
      %c0_13 = arith.constant 0 : index
      %c0_14 = arith.constant 0 : index
      %19 = vector.load %arg6[%c0_13, %c0_14] : memref<128x128xbf16, #tpu.memory_space<vmem>>, vector<128x128xbf16>
      tpu.vector_store %arg6[%c0_13, %c0_14], %18 {strides = array<i32>} : memref<128x128xbf16, #tpu.memory_space<vmem>>, vector<128x128xbf16>,
    } else {
    }
    return
  }
  func.func @transform_0(%arg0: i32, %arg1: i32, %arg2: i32) -> (i32, i32) {
    %c0_i32 = arith.constant 0 : i32
    return %arg0, %arg2 : i32, i32
  }
  func.func @transform_1(%arg0: i32, %arg1: i32, %arg2: i32) -> (i32, i32) {
    %c0_i32 = arith.constant 0 : i32
    return %arg2, %arg1 : i32, i32
  }
  func.func @transform_2(%arg0: i32, %arg1: i32, %arg2: i32) -> (i32, i32) {
    %c0_i32 = arith.constant 0 : i32
    %c0_i32_0 = arith.constant 0 : i32
    return %c0_i32, %arg1 : i32, i32
  }
  func.func @transform_3(%arg0: i32, %arg1: i32, %arg2: i32) -> (i32, i32) {
    %c0_i32 = arith.constant 0 : i32
    return %arg0, %arg1 : i32, i32
  }
}

module attributes {stable_mosaic.version = 11 : i64} {
  func.func @_gemm_bn_proj_relu_kernel(%arg0: i32, %arg1: i32, %arg2: i32, %arg3: memref<128x128xbf16, #tpu.memory_space<vmem>>, %arg4: memref<128x128xbf16, #tpu.memory_space<vmem>>, %arg5: memref<1x128xf32, #tpu.memory_space<vmem>>, %arg6: memref<128x8xbf16, #tpu.memory_space<vmem>>, %arg7: memref<8x128xbf16, #tpu.memory_space<vmem>>, %arg8: memref<128x128xf32, #tpu.memory_space<vmem>>, %arg9: memref<128x128xf32, #tpu.memory_space<vmem>>) attributes {dimension_semantics = [#tpu.dimension_semantics<parallel>, #tpu.dimension_semantics<parallel>, #tpu.dimension_semantics<arbitrary>], iteration_bounds = array<i64: 1, 1, 1>, scalar_prefetch = 0 : i64, scratch_operands = 1 : i64, tpu.core_type = #tpu.core_type<tc>, window_params = [{transform_indices = @transform_0, window_bounds = array<i64: 128, 128>}, {transform_indices = @transform_1, window_bounds = array<i64: 128, 128>}, {transform_indices = @transform_2, window_bounds = array<i64: 1, 128>}, {transform_indices = @transform_3, window_bounds = array<i64: 128, 8>}, {transform_indices = @transform_4, window_bounds = array<i64: 8, 128>}, {transform_indices = @transform_5, window_bounds = array<i64: 128, 128>}]} {
    %c0 = arith.constant 0 : index
    %c0_0 = arith.constant 0 : index
    %0 = vector.load %arg3[%c0, %c0_0] : memref<128x128xbf16, #tpu.memory_space<vmem>>, vector<128x128xbf16>
    %c0_1 = arith.constant 0 : index
    %c0_2 = arith.constant 0 : index
    %1 = vector.load %arg4[%c0_1, %c0_2] : memref<128x128xbf16, #tpu.memory_space<vmem>>, vector<128x128xbf16>
    %cst = arith.constant dense<0.000000e+00> : vector<128x128xf32>
    %2 = tpu.matmul %0, %1, %cst {dimension_numbers = #tpu.dot_dimension_numbers<[1], [0], [0], [1], [0, 0, 1, 1], [], []>} : vector<128x128xbf16>, vector<128x128xbf16>, vector<128x128xf32> -> vector<128x128xf32>
    %c0_i32 = arith.constant 0 : i32
    %3 = arith.cmpi eq, %arg2, %c0_i32 : i32
    %4 = arith.extui %3 : i1 to i32
    %c0_i32_3 = arith.constant 0 : i32
    %5 = arith.cmpi ne, %4, %c0_i32_3 : i32
    scf.if %5 {
      %c0_8 = arith.constant 0 : index
      %c0_9 = arith.constant 0 : index
      %12 = vector.load %arg6[%c0_8, %c0_9] : memref<128x8xbf16, #tpu.memory_space<vmem>>, vector<128x8xbf16>
      %c0_10 = arith.constant 0 : index
      %c0_11 = arith.constant 0 : index
      %13 = vector.load %arg7[%c0_10, %c0_11] : memref<8x128xbf16, #tpu.memory_space<vmem>>, vector<8x128xbf16>
      %cst_12 = arith.constant dense<0.000000e+00> : vector<128x128xf32>
      %14 = tpu.matmul %12, %13, %cst_12 {dimension_numbers = #tpu.dot_dimension_numbers<[1], [0], [0], [1], [0, 0, 1, 1], [], []>} : vector<128x8xbf16>, vector<8x128xbf16>, vector<128x128xf32> -> vector<128x128xf32>
      %15 = arith.addf %2, %14 : vector<128x128xf32>
      %c0_13 = arith.constant 0 : index
      %c0_14 = arith.constant 0 : index
      %16 = vector.load %arg9[%c0_13, %c0_14] : memref<128x128xf32, #tpu.memory_space<vmem>>, vector<128x128xf32>
      tpu.vector_store %arg9[%c0_13, %c0_14], %15 {strides = array<i32>} : memref<128x128xf32, #tpu.memory_space<vmem>>, vector<128x128xf32>,
    } else {
    }
    %c0_i32_4 = arith.constant 0 : i32
    %6 = arith.cmpi sgt, %arg2, %c0_i32_4 : i32
    %7 = arith.extui %6 : i1 to i32
    %c0_i32_5 = arith.constant 0 : i32
    %8 = arith.cmpi ne, %7, %c0_i32_5 : i32
    scf.if %8 {
      %c0_8 = arith.constant 0 : index
      %c0_9 = arith.constant 0 : index
      %12 = vector.load %arg9[%c0_8, %c0_9] : memref<128x128xf32, #tpu.memory_space<vmem>>, vector<128x128xf32>
      %13 = arith.addf %12, %2 : vector<128x128xf32>
      %c0_10 = arith.constant 0 : index
      %c0_11 = arith.constant 0 : index
      %14 = vector.load %arg9[%c0_10, %c0_11] : memref<128x128xf32, #tpu.memory_space<vmem>>, vector<128x128xf32>
      tpu.vector_store %arg9[%c0_10, %c0_11], %13 {strides = array<i32>} : memref<128x128xf32, #tpu.memory_space<vmem>>, vector<128x128xf32>,
    } else {
    }
    %c0_i32_6 = arith.constant 0 : i32
    %9 = arith.cmpi eq, %arg2, %c0_i32_6 : i32
    %10 = arith.extui %9 : i1 to i32
    %c0_i32_7 = arith.constant 0 : i32
    %11 = arith.cmpi ne, %10, %c0_i32_7 : i32
    scf.if %11 {
      %c0_8 = arith.constant 0 : index
      %c0_9 = arith.constant 0 : index
      %12 = vector.load %arg9[%c0_8, %c0_9] : memref<128x128xf32, #tpu.memory_space<vmem>>, vector<128x128xf32>
      %c0_10 = arith.constant 0 : index
      %c0_11 = arith.constant 0 : index
      %13 = vector.load %arg5[%c0_10, %c0_11] : memref<1x128xf32, #tpu.memory_space<vmem>>, vector<1x128xf32>
      %14 = vector.broadcast %13 : vector<1x128xf32> to vector<128x128xf32>
      %15 = arith.addf %12, %14 : vector<128x128xf32>
      %cst_12 = arith.constant 0.000000e+00 : f32
      %16 = vector.broadcast %cst_12 : f32 to vector<128x128xf32>
      %17 = arith.maximumf %15, %16 : vector<128x128xf32>
      %c0_13 = arith.constant 0 : index
      %c0_14 = arith.constant 0 : index
      %18 = vector.load %arg8[%c0_13, %c0_14] : memref<128x128xf32, #tpu.memory_space<vmem>>, vector<128x128xf32>
      tpu.vector_store %arg8[%c0_13, %c0_14], %17 {strides = array<i32>} : memref<128x128xf32, #tpu.memory_space<vmem>>, vector<128x128xf32>,
    } else {
    }
    return
  }
  func.func @transform_0(%arg0: i32, %arg1: i32, %arg2: i32) -> (i32, i32) {
    %c0_i32 = arith.constant 0 : i32
    return %arg0, %arg2 : i32, i32
  }
  func.func @transform_1(%arg0: i32, %arg1: i32, %arg2: i32) -> (i32, i32) {
    %c0_i32 = arith.constant 0 : i32
    return %arg2, %arg1 : i32, i32
  }
  func.func @transform_2(%arg0: i32, %arg1: i32, %arg2: i32) -> (i32, i32) {
    %c0_i32 = arith.constant 0 : i32
    %c0_i32_0 = arith.constant 0 : i32
    return %c0_i32, %arg1 : i32, i32
  }
  func.func @transform_3(%arg0: i32, %arg1: i32, %arg2: i32) -> (i32, i32) {
    %c0_i32 = arith.constant 0 : i32
    %c0_i32_0 = arith.constant 0 : i32
    return %arg0, %c0_i32 : i32, i32
  }
  func.func @transform_4(%arg0: i32, %arg1: i32, %arg2: i32) -> (i32, i32) {
    %c0_i32 = arith.constant 0 : i32
    %c0_i32_0 = arith.constant 0 : i32
    return %c0_i32, %arg1 : i32, i32
  }
  func.func @transform_5(%arg0: i32, %arg1: i32, %arg2: i32) -> (i32, i32) {
    %c0_i32 = arith.constant 0 : i32
    return %arg0, %arg1 : i32, i32
  }
}

</mosaic_0001>

<bundles_post_ra>
// kernel: basic_block_forward.2
= control target key start
LH: loop header
LB: loop body
LE: loop exit
PB: predicated region body
PF: predicated region fallthrough
CT: control target
= control target key end

     0   :  { %s725_s1 = inlined_call_operand.vmem [shape: bf16[128,128], index: 1, kind: input, shape index: {}]   ;;  %s726_s0 = inlined_call_operand.vmem [shape: bf16[128,128], index: 0, kind: input, shape index: {}]   ;;  %s727_s2 = inlined_call_operand.vmem [shape: f32[1,128], index: 2, kind: input, shape index: {}]   ;;  %s728_s3 = inlined_call_operand.vmem [shape: bf16[128,128], index: 3, kind: output, shape index: {}]  }
   0x1   :  { %v614_v0 = vld [vmem:[%s725_s1] sm:$0xff]   ;;  %v615_v1 = vld [vmem:[%s725_s1 + $0x8] sm:$0xff]   ;;  %v616_v2 = vld [vmem:[%s725_s1 + $0x10] sm:$0xff]  }
   0x2   :  { %566 = vmatprep.subr.bf16.mxu0 %v614_v0  ;;  %598 = vmatprep.subr.bf16.mxu1 %v614_v0  ;;  %v617_v3 = vld [vmem:[%s725_s1 + $0x18] sm:$0xff]   ;;  %v622_v4 = vld [vmem:[%s726_s0] sm:$0xff]   ;;  %v619_v7 = vld [vmem:[%s725_s1 + $0x28] sm:$0xff]  }
   0x3   :  { %567 = vmatpush3.bf16.msra.mxu0 %v614_v0  ;;  %606 = vmatpush3.bf16.msra.mxu1 %v614_v0  ;;  %v623_v5 = vld [vmem:[%s726_s0 + $0x20] sm:$0xff]   ;;  %v620_v8 = vld [vmem:[%s725_s1 + $0x30] sm:$0xff]   ;;  %v621_v9 = vld [vmem:[%s725_s1 + $0x38] sm:$0xff]  }
   0x4   :  { %568 = vmatprep.subr.bf16.mxu0 %v615_v1  ;;  %599 = vmatprep.subr.bf16.mxu1 %v615_v1  ;;  %v618_v6 = vld [vmem:[%s725_s1 + $0x20] sm:$0xff]   ;;  %v624_v10 = vld [vmem:[%s726_s0 + $0x8] sm:$0xff]   ;;  %v626_v12 = vld [vmem:[%s726_s0 + $0x10] sm:$0xff]  }
   0x5   :  { %582 = vmatprep.mubr.bf16.mxu0 %v622_v4  ;;  %590 = vmatprep.mubr.bf16.mxu1 %v623_v5  ;;  %v625_v11 = vld [vmem:[%s726_s0 + $0x28] sm:$0xff]   ;;  %v627_v13 = vld [vmem:[%s726_s0 + $0x30] sm:$0xff]   ;;  %v628_v14 = vld [vmem:[%s726_s0 + $0x18] sm:$0xff]  }
   0x6   :  { %v629_v15 = vld [vmem:[%s726_s0 + $0x38] sm:$0xff]   ;;  %v470_v16 = vld [vmem:[%s727_s2] ss:$0 sm:$0xff] }
   0x7   :  { %569 = vmatpush3.bf16.msra.mxu0 %v615_v1  ;;  %607 = vmatpush3.bf16.msra.mxu1 %v615_v1 }
   0x8   :  { %570 = vmatprep.subr.bf16.mxu0 %v616_v2  ;;  %600 = vmatprep.subr.bf16.mxu1 %v616_v2 }
   0xb   :  { %571 = vmatpush3.bf16.msra.mxu0 %v616_v2  ;;  %608 = vmatpush3.bf16.msra.mxu1 %v616_v2 }
   0xc   :  { %572 = vmatprep.subr.bf16.mxu0 %v617_v3  ;;  %601 = vmatprep.subr.bf16.mxu1 %v617_v3 }
   0xf   :  { %573 = vmatpush3.bf16.msra.mxu0 %v617_v3  ;;  %609 = vmatpush3.bf16.msra.mxu1 %v617_v3 }
  0x10   :  { %574 = vmatprep.subr.bf16.mxu0 %v618_v6  ;;  %602 = vmatprep.subr.bf16.mxu1 %v618_v6 }
  0x13   :  { %575 = vmatpush3.bf16.msra.mxu0 %v618_v6  ;;  %610 = vmatpush3.bf16.msra.mxu1 %v618_v6 }
  0x14   :  { %576 = vmatprep.subr.bf16.mxu0 %v619_v7  ;;  %603 = vmatprep.subr.bf16.mxu1 %v619_v7 }
  0x17   :  { %577 = vmatpush3.bf16.msra.mxu0 %v619_v7  ;;  %611 = vmatpush3.bf16.msra.mxu1 %v619_v7 }
  0x18   :  { %578 = vmatprep.subr.bf16.mxu0 %v620_v8  ;;  %604 = vmatprep.subr.bf16.mxu1 %v620_v8 }
  0x1b   :  { %579 = vmatpush3.bf16.msra.mxu0 %v620_v8  ;;  %612 = vmatpush3.bf16.msra.mxu1 %v620_v8 }
  0x1c   :  { %580 = vmatprep.subr.bf16.mxu0 %v621_v9  ;;  %605 = vmatprep.subr.bf16.mxu1 %v621_v9 }
  0x1f   :  { %581 = vmatpush3.bf16.msra.mxu0 %v621_v9  ;;  %613 = vmatpush3.bf16.msra.mxu1 %v621_v9 }
  0x22   :  { %583 = vmatmul.mubr.bf16.vlgmr.msra.gmra.mrb[0].mxu0 %v624_v10  ;;  %591 = vmatmul.mubr.bf16.vlgmr.msra.gmra.mrb[0].mxu1 %v625_v11 }
  0x23   :  { %586 = vmatprep.mubr.bf16.mxu0 %v626_v12  ;;  %594 = vmatprep.mubr.bf16.mxu1 %v627_v13 }
  0x2a   :  { %587 = vmatmul.mubr.bf16.gmra.mrb[4].mxu0 %v628_v14  ;;  %595 = vmatmul.mubr.bf16.gmra.mrb[4].mxu1 %v629_v15 }
  0xf5   :  { %v584_v17 = vpop.f32.mrb[0].mxu0  ;;  %v592_v18 = vpop.f32.mrb[0].mxu1 }
  0xf6   :  { %v340_v19 = vadd.f32 %v584_v17, %v470_v16  ;;  %v348_v20 = vadd.f32 %v592_v18, %v470_v16  ;;  %v177_v21 = vpop.f32.mrb[1].mxu0  ;;  %v209_v22 = vpop.f32.mrb[1].mxu1 }
  0xf7   :  { %v338_v23 = vadd.f32 %v470_v16, %v177_v21  ;;  %v346_v24 = vadd.f32 %v470_v16, %v209_v22  ;;  %v585_v25 = vpop.f32.mrb[2].mxu0  ;;  %v593_v26 = vpop.f32.mrb[2].mxu1 }
  0xf8   :  { %v341_v27 = vadd.f32 %v585_v25, %v470_v16  ;;  %v349_v28 = vadd.f32 %v593_v26, %v470_v16  ;;  %v180_v29 = vpop.f32.mrb[3].mxu0  ;;  %v212_v30 = vpop.f32.mrb[3].mxu1  ;;  %v356_v33 = vmax.f32 %v340_v19, 0.0  ;;  %v364_v34 = vmax.f32 %v348_v20, 0.0 }
  0xf9   :  { %v339_v31 = vadd.f32 %v470_v16, %v180_v29  ;;  %v347_v32 = vadd.f32 %v470_v16, %v212_v30  ;;  %v354_v37 = vmax.f32 %v338_v23, 0.0  ;;  %v362_v38 = vmax.f32 %v346_v24, 0.0 }
  0xfa   :  { %v357_v35 = vmax.f32 %v341_v27, 0.0  ;;  %v365_v36 = vmax.f32 %v349_v28, 0.0 }
  0xfb   :  { %v355_v39 = vmax.f32 %v339_v31, 0.0  ;;  %v363_v40 = vmax.f32 %v347_v32, 0.0 }
  0xfc   :  { %v511_v41 = vpack.c.bf16 %v357_v35, %v356_v33  ;;  %v531_v42 = vpack.c.bf16 %v365_v36, %v364_v34 }
  0xfd   :  { %v506_v43 = vpack.c.bf16 %v355_v39, %v354_v37  ;;  %v526_v44 = vpack.c.bf16 %v363_v40, %v362_v38  ;;  %v588_v45 = vpop.f32.mrb[4].mxu0  ;;  %v596_v46 = vpop.f32.mrb[4].mxu1 }
  0xfe   :  { %543 = vst [vmem:[%s728_s3 + $0x8] sm:$0xff] %v511_v41   ;;  %547 = vst [vmem:[%s728_s3 + $0x28] sm:$0xff] %v531_v42   ;;  %v344_v47 = vadd.f32 %v588_v45, %v470_v16  ;;  %v352_v48 = vadd.f32 %v596_v46, %v470_v16  ;;  %v193_v49 = vpop.f32.mrb[5].mxu0  ;;  %v225_v50 = vpop.f32.mrb[5].mxu1 }
  0xff   :  { %507 = vst [vmem:[%s728_s3] sm:$0xff] %v506_v43   ;;  %546 = vst [vmem:[%s728_s3 + $0x20] sm:$0xff] %v526_v44   ;;  %v342_v51 = vadd.f32 %v470_v16, %v193_v49  ;;  %v350_v52 = vadd.f32 %v470_v16, %v225_v50  ;;  %v589_v53 = vpop.f32.mrb[6].mxu0  ;;  %v597_v54 = vpop.f32.mrb[6].mxu1 }
 0x100   :  { %v345_v55 = vadd.f32 %v589_v53, %v470_v16  ;;  %v353_v56 = vadd.f32 %v597_v54, %v470_v16  ;;  %v196_v57 = vpop.f32.mrb[7].mxu0  ;;  %v228_v58 = vpop.f32.mrb[7].mxu1  ;;  %v360_v61 = vmax.f32 %v344_v47, 0.0  ;;  %v368_v62 = vmax.f32 %v352_v48, 0.0 }
 0x101   :  { %v343_v59 = vadd.f32 %v470_v16, %v196_v57  ;;  %v351_v60 = vadd.f32 %v470_v16, %v228_v58  ;;  %v358_v1 = vmax.f32 %v342_v51, 0.0  ;;  %v366_v2 = vmax.f32 %v350_v52, 0.0 }
 0x102   :  { %v361_v63 = vmax.f32 %v345_v55, 0.0  ;;  %v369_v0 = vmax.f32 %v353_v56, 0.0 }
 0x103   :  { %v359_v3 = vmax.f32 %v343_v59, 0.0  ;;  %v367_v4 = vmax.f32 %v351_v60, 0.0 }
 0x104   :  { %v521_v5 = vpack.c.bf16 %v361_v63, %v360_v61  ;;  %v541_v6 = vpack.c.bf16 %v369_v0, %v368_v62 }
 0x105   :  { %v516_v7 = vpack.c.bf16 %v359_v3, %v358_v1  ;;  %v536_v8 = vpack.c.bf16 %v367_v4, %v366_v2 }
 0x106   :  { %545 = vst [vmem:[%s728_s3 + $0x18] sm:$0xff] %v521_v5   ;;  %549 = vst [vmem:[%s728_s3 + $0x38] sm:$0xff] %v541_v6  }
 0x107   :  { %544 = vst [vmem:[%s728_s3 + $0x10] sm:$0xff] %v516_v7   ;;  %548 = vst [vmem:[%s728_s3 + $0x30] sm:$0xff] %v536_v8  }

// kernel: basic_block_forward.3
= control target key start
LH: loop header
LB: loop body
LE: loop exit
PB: predicated region body
PF: predicated region fallthrough
CT: control target
= control target key end

     0   :  { %vm332_vm0 = vcmask 1043456   ;;  %vm307_vm1 = vcmask 64512   ;;  %s926_s1 = inlined_call_operand.vmem [shape: bf16[128,128], index: 1, kind: input, shape index: {}]   ;;  %s927_s4 = inlined_call_operand.vmem [shape: bf16[8,128], index: 4, kind: input, shape index: {}]   ;;  %s928_s3 = inlined_call_operand.vmem [shape: bf16[128,8], index: 3, kind: input, shape index: {}]   ;;  %s929_s0 = inlined_call_operand.vmem [shape: bf16[128,128], index: 0, kind: input, shape index: {}]   ;;  %s930_s2 = inlined_call_operand.vmem [shape: f32[1,128], index: 2, kind: input, shape index: {}]   ;;  %s931_s5 = inlined_call_operand.vmem [shape: f32[128,128], index: 5, kind: output, shape index: {}]  }
   0x1   :  { %v720_v0 = vld [vmem:[%s926_s1] sm:$0xff]   ;;  %v721_v1 = vld [vmem:[%s926_s1 + $0x8] sm:$0xff]   ;;  %v722_v2 = vld [vmem:[%s926_s1 + $0x10] sm:$0xff]  }
   0x2   :  { %653 = vmatprep.subr.bf16.mxu1 %v720_v0  ;;  %v266_v3 = vld [vmem:[%s927_s4] sm:$0xf]  ;;  %v723_v4 = vld [vmem:[%s926_s1 + $0x18] sm:$0xff]   ;;  %v729_v7 = vld [vmem:[%s928_s3 + $0x8] sm:$0xff]  }
   0x3   :  { %654 = vmatpush3.bf16.msra.mxu1 %v720_v0  ;;  %719 = vmatprep.subr.msk.bf16.mxu0 %vm332_vm0, %v266_v3  ;;  %v334_v5 = vsel %vm332_vm0, %v266_v3, 0  ;;  %v728_v6 = vld [vmem:[%s928_s3] sm:$0xff]   ;;  %v732_v10 = vld [vmem:[%s928_s3 + $0x10] sm:$0xff]   ;;  %v725_v11 = vld [vmem:[%s926_s1 + $0x28] sm:$0xff]  }
   0x4   :  { %655 = vmatprep.subr.bf16.mxu1 %v721_v1  ;;  %686 = vmatpush3.bf16.msra.mxu0 %v334_v5  ;;  %v730_v8 = vld [vmem:[%s929_s0] sm:$0xff]   ;;  %v733_v12 = vld [vmem:[%s928_s3 + $0x18] sm:$0xff]   ;;  %v726_v14 = vld [vmem:[%s926_s1 + $0x30] sm:$0xff]  }
   0x5   :  { %687 = vmatprep.mubr.msk.bf16.mxu0 %vm307_vm1, %v728_v6  ;;  %v724_v9 = vld [vmem:[%s926_s1 + $0x20] sm:$0xff]   ;;  %669 = vmatprep.mubr.bf16.mxu1 %v730_v8  ;;  %v727_v15 = vld [vmem:[%s926_s1 + $0x38] sm:$0xff]   ;;  %v737_v16 = vld [vmem:[%s928_s3 + $0x28] sm:$0xff]  }
   0x6   :  { %v736_v13 = vld [vmem:[%s928_s3 + $0x20] sm:$0xff]   ;;  %v740_v17 = vld [vmem:[%s928_s3 + $0x30] sm:$0xff]   ;;  %v731_v18 = vld [vmem:[%s929_s0 + $0x8] sm:$0xff]  }
   0x7   :  { %656 = vmatpush3.bf16.msra.mxu1 %v721_v1  ;;  %688 = vmatmul.mubr.msk.bf16.vlgmr.msra.gmra.mrb[0].mxu0 %vm307_vm1, %v729_v7  ;;  %v734_v19 = vld [vmem:[%s929_s0 + $0x10] sm:$0xff]   ;;  %v741_v20 = vld [vmem:[%s928_s3 + $0x38] sm:$0xff]   ;;  %v738_v22 = vld [vmem:[%s929_s0 + $0x20] sm:$0xff]  }
   0x8   :  { %657 = vmatprep.subr.bf16.mxu1 %v722_v2  ;;  %691 = vmatprep.mubr.msk.bf16.mxu0 %vm307_vm1, %v732_v10  ;;  %v735_v21 = vld [vmem:[%s929_s0 + $0x18] sm:$0xff]   ;;  %v739_v23 = vld [vmem:[%s929_s0 + $0x28] sm:$0xff]   ;;  %v742_v24 = vld [vmem:[%s929_s0 + $0x30] sm:$0xff]  }
   0x9   :  { %v743_v25 = vld [vmem:[%s929_s0 + $0x38] sm:$0xff]   ;;  %v860_v39 = vld [vmem:[%s930_s2] ss:$0 sm:$0xff] }
   0xb   :  { %658 = vmatpush3.bf16.msra.mxu1 %v722_v2 }
   0xc   :  { %659 = vmatprep.subr.bf16.mxu1 %v723_v4 }
   0xf   :  { %660 = vmatpush3.bf16.msra.mxu1 %v723_v4  ;;  %692 = vmatmul.mubr.msk.bf16.gmra.mrb[4].mxu0 %vm307_vm1, %v733_v12 }
  0x10   :  { %661 = vmatprep.subr.bf16.mxu1 %v724_v9  ;;  %695 = vmatprep.mubr.msk.bf16.mxu0 %vm307_vm1, %v736_v13 }
  0x13   :  { %662 = vmatpush3.bf16.msra.mxu1 %v724_v9 }
  0x14   :  { %663 = vmatprep.subr.bf16.mxu1 %v725_v11 }
  0x17   :  { %664 = vmatpush3.bf16.msra.mxu1 %v725_v11  ;;  %696 = vmatmul.mubr.msk.bf16.gmra.mrb[8].mxu0 %vm307_vm1, %v737_v16 }
  0x18   :  { %665 = vmatprep.subr.bf16.mxu1 %v726_v14  ;;  %699 = vmatprep.mubr.msk.bf16.mxu0 %vm307_vm1, %v740_v17 }
  0x1b   :  { %666 = vmatpush3.bf16.msra.mxu1 %v726_v14 }
  0x1c   :  { %667 = vmatprep.subr.bf16.mxu1 %v727_v15 }
  0x1f   :  { %668 = vmatpush3.bf16.msra.mxu1 %v727_v15  ;;  %700 = vmatmul.mubr.msk.bf16.gmra.mrb[12].mxu0 %vm307_vm1, %v741_v20 }
  0x22   :  { %670 = vmatmul.mubr.bf16.vlgmr.msra.gmra.mrb[0].mxu1 %v731_v18 }
  0x23   :  { %673 = vmatprep.mubr.bf16.mxu1 %v734_v19 }
  0x2a   :  { %674 = vmatmul.mubr.bf16.gmra.mrb[4].mxu1 %v735_v21 }
  0x2b   :  { %677 = vmatprep.mubr.bf16.mxu1 %v738_v22 }
  0x32   :  { %678 = vmatmul.mubr.bf16.gmra.mrb[8].mxu1 %v739_v23 }
  0x33   :  { %681 = vmatprep.mubr.bf16.mxu1 %v742_v24 }
  0x3a   :  { %682 = vmatmul.mubr.bf16.gmra.mrb[12].mxu1 %v743_v25 }
  0xda   :  { %v689_v26 = vpop.f32.mrb[0].mxu0 }
  0xdb   :  { %v370_v27 = vpop.f32.mrb[1].mxu0 }
  0xdc   :  { %v690_v28 = vpop.f32.mrb[2].mxu0 }
  0xdd   :  { %v373_v29 = vpop.f32.mrb[3].mxu0 }
  0xe2   :  { %v693_v30 = vpop.f32.mrb[4].mxu0 }
  0xe3   :  { %v386_v31 = vpop.f32.mrb[5].mxu0 }
  0xe4   :  { %v694_v32 = vpop.f32.mrb[6].mxu0 }
  0xe5   :  { %v389_v33 = vpop.f32.mrb[7].mxu0 }
  0xea   :  { %v697_v34 = vpop.f32.mrb[8].mxu0 }
  0xeb   :  { %v402_v35 = vpop.f32.mrb[9].mxu0 }
  0xec   :  { %v698_v36 = vpop.f32.mrb[10].mxu0 }
  0xed   :  { %v405_v37 = vpop.f32.mrb[11].mxu0 }
  0xf2   :  { %v701_v44 = vpop.f32.mrb[12].mxu0 }
  0xf3   :  { %v418_v48 = vpop.f32.mrb[13].mxu0 }
  0xf4   :  { %v702_v51 = vpop.f32.mrb[14].mxu0 }
  0xf5   :  { %v671_v38 = vpop.f32.mrb[0].mxu1  ;;  %v421_v54 = vpop.f32.mrb[15].mxu0 }
  0xf6   :  { %v435_v40 = vadd.f32 %v689_v26, %v671_v38  ;;  %v183_v41 = vpop.f32.mrb[1].mxu1 }
  0xf7   :  { %v433_v42 = vadd.f32 %v370_v27, %v183_v41  ;;  %v672_v43 = vpop.f32.mrb[2].mxu1 }
  0xf8   :  { %v545_v45 = vadd.f32 %v860_v39, %v435_v40  ;;  %v436_v46 = vadd.f32 %v690_v28, %v672_v43  ;;  %v186_v47 = vpop.f32.mrb[3].mxu1 }
  0xf9   :  { %v543_v49 = vadd.f32 %v860_v39, %v433_v42  ;;  %v434_v50 = vadd.f32 %v373_v29, %v186_v47 }
  0xfa   :  { %v561_v52 = vmax.f32 %v545_v45, 0.0  ;;  %v546_v53 = vadd.f32 %v860_v39, %v436_v46 }
  0xfb   :  { %v559_v55 = vmax.f32 %v543_v49, 0.0  ;;  %v544_v56 = vadd.f32 %v860_v39, %v434_v50 }
  0xfc   :  { %577 = vst [vmem:[%s931_s5 + $0x10] sm:$0xff] %v561_v52  ;;  %v562_v57 = vmax.f32 %v546_v53, 0.0 }
  0xfd   :  { %575 = vst [vmem:[%s931_s5] sm:$0xff] %v559_v55  ;;  %v560_v58 = vmax.f32 %v544_v56, 0.0  ;;  %v675_v59 = vpop.f32.mrb[4].mxu1 }
  0xfe   :  { %578 = vst [vmem:[%s931_s5 + $0x18] sm:$0xff] %v562_v57  ;;  %v439_v60 = vadd.f32 %v693_v30, %v675_v59  ;;  %v199_v61 = vpop.f32.mrb[5].mxu1 }
  0xff   :  { %576 = vst [vmem:[%s931_s5 + $0x8] sm:$0xff] %v560_v58  ;;  %v437_v62 = vadd.f32 %v386_v31, %v199_v61  ;;  %v676_v63 = vpop.f32.mrb[6].mxu1 }
 0x100   :  { %v549_v0 = vadd.f32 %v860_v39, %v439_v60  ;;  %v440_v1 = vadd.f32 %v694_v32, %v676_v63  ;;  %v202_v2 = vpop.f32.mrb[7].mxu1 }
 0x101   :  { %v547_v3 = vadd.f32 %v860_v39, %v437_v62  ;;  %v438_v4 = vadd.f32 %v389_v33, %v202_v2 }
 0x102   :  { %v565_v5 = vmax.f32 %v549_v0, 0.0  ;;  %v550_v6 = vadd.f32 %v860_v39, %v440_v1 }
 0x103   :  { %v563_v7 = vmax.f32 %v547_v3, 0.0  ;;  %v548_v8 = vadd.f32 %v860_v39, %v438_v4 }
 0x104   :  { %581 = vst [vmem:[%s931_s5 + $0x30] sm:$0xff] %v565_v5  ;;  %v566_v9 = vmax.f32 %v550_v6, 0.0 }
 0x105   :  { %579 = vst [vmem:[%s931_s5 + $0x20] sm:$0xff] %v563_v7  ;;  %v564_v10 = vmax.f32 %v548_v8, 0.0  ;;  %v679_v11 = vpop.f32.mrb[8].mxu1 }
 0x106   :  { %582 = vst [vmem:[%s931_s5 + $0x38] sm:$0xff] %v566_v9  ;;  %v443_v12 = vadd.f32 %v697_v34, %v679_v11  ;;  %v215_v13 = vpop.f32.mrb[9].mxu1 }
 0x107   :  { %580 = vst [vmem:[%s931_s5 + $0x28] sm:$0xff] %v564_v10  ;;  %v441_v14 = vadd.f32 %v402_v35, %v215_v13  ;;  %v680_v15 = vpop.f32.mrb[10].mxu1 }
 0x108   :  { %v553_v16 = vadd.f32 %v860_v39, %v443_v12  ;;  %v444_v17 = vadd.f32 %v698_v36, %v680_v15  ;;  %v218_v18 = vpop.f32.mrb[11].mxu1 }
 0x109   :  { %v551_v19 = vadd.f32 %v860_v39, %v441_v14  ;;  %v442_v20 = vadd.f32 %v405_v37, %v218_v18 }
 0x10a   :  { %v569_v21 = vmax.f32 %v553_v16, 0.0  ;;  %v554_v22 = vadd.f32 %v860_v39, %v444_v17 }
 0x10b   :  { %v567_v23 = vmax.f32 %v551_v19, 0.0  ;;  %v552_v24 = vadd.f32 %v860_v39, %v442_v20 }
 0x10c   :  { %585 = vst [vmem:[%s931_s5 + $0x50] sm:$0xff] %v569_v21  ;;  %v570_v25 = vmax.f32 %v554_v22, 0.0 }
 0x10d   :  { %583 = vst [vmem:[%s931_s5 + $0x40] sm:$0xff] %v567_v23  ;;  %v568_v26 = vmax.f32 %v552_v24, 0.0  ;;  %v683_v27 = vpop.f32.mrb[12].mxu1 }
 0x10e   :  { %586 = vst [vmem:[%s931_s5 + $0x58] sm:$0xff] %v570_v25  ;;  %v447_v28 = vadd.f32 %v701_v44, %v683_v27  ;;  %v231_v29 = vpop.f32.mrb[13].mxu1 }
 0x10f   :  { %584 = vst [vmem:[%s931_s5 + $0x48] sm:$0xff] %v568_v26  ;;  %v445_v30 = vadd.f32 %v418_v48, %v231_v29  ;;  %v684_v31 = vpop.f32.mrb[14].mxu1 }
 0x110   :  { %v557_v32 = vadd.f32 %v860_v39, %v447_v28  ;;  %v448_v33 = vadd.f32 %v702_v51, %v684_v31  ;;  %v234_v34 = vpop.f32.mrb[15].mxu1 }
 0x111   :  { %v555_v35 = vadd.f32 %v860_v39, %v445_v30  ;;  %v446_v36 = vadd.f32 %v421_v54, %v234_v34 }
 0x112   :  { %v573_v37 = vmax.f32 %v557_v32, 0.0  ;;  %v558_v38 = vadd.f32 %v860_v39, %v448_v33 }
 0x113   :  { %v571_v40 = vmax.f32 %v555_v35, 0.0  ;;  %v556_v41 = vadd.f32 %v860_v39, %v446_v36 }
 0x114   :  { %589 = vst [vmem:[%s931_s5 + $0x70] sm:$0xff] %v573_v37  ;;  %v574_v42 = vmax.f32 %v558_v38, 0.0 }
 0x115   :  { %587 = vst [vmem:[%s931_s5 + $0x60] sm:$0xff] %v571_v40  ;;  %v572_v43 = vmax.f32 %v556_v41, 0.0 }
 0x116   :  { %590 = vst [vmem:[%s931_s5 + $0x78] sm:$0xff] %v574_v42 }
 0x117   :  { %588 = vst [vmem:[%s931_s5 + $0x68] sm:$0xff] %v572_v43 }

</bundles_post_ra>
